<compile_context>
chip_gen: v6e
topology: v6e:2x2x1
jax: 0.10.0
libtpu: 0.0.40
codegen_flags: <defaults>
</compile_context>

<pallas_src>
import functools

import jax
import jax.numpy as jnp
from jax.experimental import pallas as pl
from jax.experimental.pallas import tpu as pltpu

PAIRWISE_EPS = 1e-6  # matches F.pairwise_distance default eps


def _contrastive_loss_kernel(o1_ref, o2_ref, label_ref, loss_ref, *, n_rows, margin):
    i = pl.program_id(0)
    n_tiles = pl.num_programs(0)
    tb = o1_ref.shape[0]

    # Accumulator lives in the resident (1,1) output block.
    @pl.when(i == 0)
    def _():
        loss_ref[...] = jnp.zeros_like(loss_ref)

    # Widen once per tile; inputs arrive in native dtype (bf16 stays bf16 over HBM).
    o1 = o1_ref[...].astype(jnp.float32)                 # (TB, D)
    o2 = o2_ref[...].astype(jnp.float32)                 # (TB, D)
    label = label_ref[...].astype(jnp.float32)           # (TB, 1)

    diff = o1 - o2 + PAIRWISE_EPS                        # torch adds eps to the diff
    sq_dist = jnp.sum(diff * diff, axis=-1, keepdims=True)   # (TB, 1) = d^2
    dist = jnp.sqrt(sq_dist)                             # (TB, 1) = d

    hinge = jnp.maximum(margin - dist, 0.0)
    per_row = label * sq_dist + (1.0 - label) * hinge * hinge   # (TB, 1)

    # Mask rows belonging to the zero-padded tail of the last tile.
    row_idx = i * tb + jax.lax.broadcasted_iota(jnp.int32, per_row.shape, 0)
    per_row = jnp.where(row_idx < n_rows, per_row, 0.0)

    loss_ref[...] += jnp.sum(per_row, keepdims=True)     # (1,1) running sum

    @pl.when(i == n_tiles - 1)
    def _():
        loss_ref[...] = loss_ref[...] / jnp.float32(n_rows)   # mean over TRUE batch


def _round_up(x, m):
    return ((x + m - 1) // m) * m


def _pick_tile_rows(B, D, dtype):
    """Largest row tile (multiple of 8) keeping 2 inputs x 2 buffers comfortably in VMEM."""
    itemsize = jnp.dtype(dtype).itemsize
    per_input_budget = 8 * 1024 * 1024          # => <= ~32 MiB total buffered; safe on v7x
    max_rows = max(8, per_input_budget // max(1, D * itemsize))
    tb = min(1024, _round_up(B, 8), max_rows)
    tb = max(8, (tb // 8) * 8)
    return tb


def contrastive_loss(output1, output2, label, margin=1.0):
    B, D = output1.shape
    tb = _pick_tile_rows(B, D, output1.dtype)
    b_pad = _round_up(B, tb)
    n_tiles = b_pad // tb

    label2d = label.reshape(B, 1).astype(jnp.float32)
    if b_pad != B:
        pad = b_pad - B
        output1 = jnp.pad(output1, ((0, pad), (0, 0)))
        output2 = jnp.pad(output2, ((0, pad), (0, 0)))
        label2d = jnp.pad(label2d, ((0, pad), (0, 0)))

    kernel = functools.partial(
        _contrastive_loss_kernel, n_rows=B, margin=float(margin)
    )

    loss = pl.pallas_call(
        kernel,
        out_shape=jax.ShapeDtypeStruct((1, 1), jnp.float32),
        grid=(n_tiles,),
        in_specs=[
            pl.BlockSpec((tb, D), lambda i: (i, 0)),   # output1 tile (native dtype)
            pl.BlockSpec((tb, D), lambda i: (i, 0)),   # output2 tile (native dtype)
            pl.BlockSpec((tb, 1), lambda i: (i, 0)),   # label tile
        ],
        out_specs=pl.BlockSpec((1, 1), lambda i: (0, 0)),   # resident accumulator
        compiler_params=pltpu.CompilerParams(
            dimension_semantics=("arbitrary",),
        ),
    )(output1, output2, label2d)
    return loss[0, 0]


def _reference(output1, output2, label, margin=1.0):
    o1 = output1.astype(jnp.float32)
    o2 = output2.astype(jnp.float32)
    d = jnp.sqrt(jnp.sum((o1 - o2 + PAIRWISE_EPS) ** 2, axis=-1))
    return jnp.mean(
        label * d ** 2 + (1 - label) * jnp.maximum(margin - d, 0.0) ** 2
    )


if __name__ == "__main__":
    key = jax.random.PRNGKey(0)

    # Case 1: small f32, batch divides the tile exactly.
    k1, k2, k3, key = *jax.random.split(key, 3), jax.random.split(key, 4)[3]
    B, D = 8, 32
    o1 = jax.random.normal(k1, (B, D), dtype=jnp.float32)
    o2 = jax.random.normal(k2, (B, D), dtype=jnp.float32)
    lab = jax.random.bernoulli(k3, 0.5, (B,)).astype(jnp.float32)
    loss = contrastive_loss(o1, o2, lab)
    jax.block_until_ready(loss)
    ref = _reference(o1, o2, lab)
    assert jnp.allclose(loss, ref, rtol=1e-5, atol=1e-5), (loss, ref)

    # Case 2: ragged batch (exercises last-tile masking / padded rows).
    k1, k2, k3, key = *jax.random.split(key, 3), jax.random.split(key, 4)[3]
    B, D = 13, 32
    o1 = jax.random.normal(k1, (B, D), dtype=jnp.float32)
    o2 = jax.random.normal(k2, (B, D), dtype=jnp.float32)
    lab = jax.random.bernoulli(k3, 0.5, (B,)).astype(jnp.float32)
    loss = contrastive_loss(o1, o2, lab)
    jax.block_until_ready(loss)
    ref = _reference(o1, o2, lab)
    assert jnp.allclose(loss, ref, rtol=1e-5, atol=1e-5), (loss, ref)

    # Case 3: bf16 inputs stay bf16 over HBM; kernel widens to f32 internally.
    k1, k2, k3 = jax.random.split(key, 3)
    B, D = 16, 128
    o1 = jax.random.normal(k1, (B, D), dtype=jnp.bfloat16)
    o2 = jax.random.normal(k2, (B, D), dtype=jnp.bfloat16)
    lab = jax.random.bernoulli(k3, 0.5, (B,)).astype(jnp.float32)
    loss = contrastive_loss(o1, o2, lab)
    jax.block_until_ready(loss)
    ref = _reference(o1, o2, lab)
    assert jnp.allclose(loss, ref, rtol=1e-2, atol=1e-2), (loss, ref)

    print("KERNEL_OK")
</pallas_src>

<mosaic_0001>
module attributes {stable_mosaic.version = 11 : i64} {
  func.func @_contrastive_loss_kernel(%arg0: i32, %arg1: memref<8x32xf32, #tpu.memory_space<vmem>>, %arg2: memref<8x32xf32, #tpu.memory_space<vmem>>, %arg3: memref<8x1xf32, #tpu.memory_space<vmem>>, %arg4: memref<1x1xf32, #tpu.memory_space<vmem>>) attributes {dimension_semantics = [#tpu.dimension_semantics<arbitrary>], iteration_bounds = array<i64: 1>, scalar_prefetch = 0 : i64, scratch_operands = 0 : i64, tpu.core_type = #tpu.core_type<tc>, window_params = [{transform_indices = @transform_0, window_bounds = array<i64: 8, 32>}, {transform_indices = @transform_1, window_bounds = array<i64: 8, 32>}, {transform_indices = @transform_2, window_bounds = array<i64: 8, 1>}, {pipeline_mode = #tpu.pipeline_mode<synchronous>, transform_indices = @transform_3, window_bounds = array<i64: 1, 1>}]} {
    %c0_i32 = arith.constant 0 : i32
    %0 = arith.cmpi eq, %arg0, %c0_i32 : i32
    %1 = arith.extui %0 : i1 to i32
    %c0_i32_0 = arith.constant 0 : i32
    %2 = arith.cmpi ne, %1, %c0_i32_0 : i32
    scf.if %2 {
      %cst_19 = arith.constant 0.000000e+00 : f32
      %42 = vector.broadcast %cst_19 : f32 to vector<1x1xf32>
      %c0_20 = arith.constant 0 : index
      %c0_21 = arith.constant 0 : index
      %43 = vector.load %arg4[%c0_20, %c0_21] : memref<1x1xf32, #tpu.memory_space<vmem>>, vector<1x1xf32>
      tpu.vector_store %arg4[%c0_20, %c0_21], %42 {strides = array<i32>} : memref<1x1xf32, #tpu.memory_space<vmem>>, vector<1x1xf32>,
    } else {
    }
    %c0 = arith.constant 0 : index
    %c0_1 = arith.constant 0 : index
    %3 = vector.load %arg1[%c0, %c0_1] : memref<8x32xf32, #tpu.memory_space<vmem>>, vector<8x32xf32>
    %c0_2 = arith.constant 0 : index
    %c0_3 = arith.constant 0 : index
    %4 = vector.load %arg2[%c0_2, %c0_3] : memref<8x32xf32, #tpu.memory_space<vmem>>, vector<8x32xf32>
    %c0_4 = arith.constant 0 : index
    %c0_5 = arith.constant 0 : index
    %5 = vector.load %arg3[%c0_4, %c0_5] : memref<8x1xf32, #tpu.memory_space<vmem>>, vector<8x1xf32>
    %6 = arith.subf %3, %4 : vector<8x32xf32>
    %cst = arith.constant 9.99999997E-7 : f32
    %7 = vector.broadcast %cst : f32 to vector<8x32xf32>
    %8 = arith.addf %6, %7 : vector<8x32xf32>
    %9 = arith.mulf %8, %8 : vector<8x32xf32>
    %cst_6 = arith.constant dense<0.000000e+00> : vector<8xf32>
    %10 = vector.multi_reduction <add>, %9, %cst_6 [1] : vector<8x32xf32> to vector<8xf32>
    %11 = vector.shape_cast %10 : vector<8xf32> to vector<8x1xf32>
    %12 = math.sqrt %11 : vector<8x1xf32>
    %cst_7 = arith.constant 1.000000e+00 : f32
    %13 = vector.broadcast %cst_7 : f32 to vector<8x1xf32>
    %14 = arith.subf %13, %12 : vector<8x1xf32>
    %cst_8 = arith.constant 0.000000e+00 : f32
    %15 = vector.broadcast %cst_8 : f32 to vector<8x1xf32>
    %16 = arith.maximumf %14, %15 : vector<8x1xf32>
    %17 = arith.mulf %5, %11 : vector<8x1xf32>
    %cst_9 = arith.constant 1.000000e+00 : f32
    %18 = vector.broadcast %cst_9 : f32 to vector<8x1xf32>
    %19 = arith.subf %18, %5 : vector<8x1xf32>
    %20 = arith.mulf %19, %16 : vector<8x1xf32>
    %21 = arith.mulf %20, %16 : vector<8x1xf32>
    %22 = arith.addf %17, %21 : vector<8x1xf32>
    %c8_i32 = arith.constant 8 : i32
    %23 = arith.muli %arg0, %c8_i32 : i32
    %24 = tpu.iota {dimensions = array<i32: 0>} : vector<8x1xi32>
    %25 = vector.broadcast %23 : i32 to vector<8x1xi32>
    %26 = arith.addi %25, %24 : vector<8x1xi32>
    %c8_i32_10 = arith.constant 8 : i32
    %27 = vector.broadcast %c8_i32_10 : i32 to vector<8x1xi32>
    %28 = arith.cmpi slt, %26, %27 : vector<8x1xi32>
    %cst_11 = arith.constant 0.000000e+00 : f32
    %29 = vector.broadcast %cst_11 : f32 to vector<8x1xf32>
    %30 = arith.select %28, %22, %29 : vector<8x1xi1>, vector<8x1xf32>
    %c0_12 = arith.constant 0 : index
    %c0_13 = arith.constant 0 : index
    %31 = vector.load %arg4[%c0_12, %c0_13] : memref<1x1xf32, #tpu.memory_space<vmem>>, vector<1x1xf32>
    %32 = vector.shape_cast %30 : vector<8x1xf32> to vector<1x8x1xf32>
    %cst_14 = arith.constant dense<0.000000e+00> : vector<1xf32>
    %33 = vector.multi_reduction <add>, %32, %cst_14 [1, 2] : vector<1x8x1xf32> to vector<1xf32>
    %34 = vector.shape_cast %33 : vector<1xf32> to vector<1x1x1xf32>
    %35 = vector.extract %34[0, 0, 0] : f32 from vector<1x1x1xf32>
    %36 = vector.broadcast %35 : f32 to vector<1x1xf32>
    %37 = arith.addf %31, %36 : vector<1x1xf32>
    %c0_15 = arith.constant 0 : index
    %c0_16 = arith.constant 0 : index
    %38 = vector.load %arg4[%c0_15, %c0_16] : memref<1x1xf32, #tpu.memory_space<vmem>>, vector<1x1xf32>
    tpu.vector_store %arg4[%c0_15, %c0_16], %37 {strides = array<i32>} : memref<1x1xf32, #tpu.memory_space<vmem>>, vector<1x1xf32>,
    %c0_i32_17 = arith.constant 0 : i32
    %39 = arith.cmpi eq, %arg0, %c0_i32_17 : i32
    %40 = arith.extui %39 : i1 to i32
    %c0_i32_18 = arith.constant 0 : i32
    %41 = arith.cmpi ne, %40, %c0_i32_18 : i32
    scf.if %41 {
      %c0_19 = arith.constant 0 : index
      %c0_20 = arith.constant 0 : index
      %42 = vector.load %arg4[%c0_19, %c0_20] : memref<1x1xf32, #tpu.memory_space<vmem>>, vector<1x1xf32>
      %cst_21 = arith.constant 8.000000e+00 : f32
      %43 = vector.broadcast %cst_21 : f32 to vector<1x1xf32>
      %44 = arith.divf %42, %43 : vector<1x1xf32>
      %c0_22 = arith.constant 0 : index
      %c0_23 = arith.constant 0 : index
      %45 = vector.load %arg4[%c0_22, %c0_23] : memref<1x1xf32, #tpu.memory_space<vmem>>, vector<1x1xf32>
      tpu.vector_store %arg4[%c0_22, %c0_23], %44 {strides = array<i32>} : memref<1x1xf32, #tpu.memory_space<vmem>>, vector<1x1xf32>,
    } else {
    }
    return
  }
  func.func @transform_0(%arg0: i32) -> (i32, i32) {
    %c0_i32 = arith.constant 0 : i32
    %c0_i32_0 = arith.constant 0 : i32
    return %arg0, %c0_i32 : i32, i32
  }
  func.func @transform_1(%arg0: i32) -> (i32, i32) {
    %c0_i32 = arith.constant 0 : i32
    %c0_i32_0 = arith.constant 0 : i32
    return %arg0, %c0_i32 : i32, i32
  }
  func.func @transform_2(%arg0: i32) -> (i32, i32) {
    %c0_i32 = arith.constant 0 : i32
    %c0_i32_0 = arith.constant 0 : i32
    return %arg0, %c0_i32 : i32, i32
  }
  func.func @transform_3(%arg0: i32) -> (i32, i32) {
    %c0_i32 = arith.constant 0 : i32
    %c0_i32_0 = arith.constant 0 : i32
    %c0_i32_1 = arith.constant 0 : i32
    return %c0_i32, %c0_i32_0 : i32, i32
  }
}

</mosaic_0001>

<bundles_post_ra>
// kernel: tpu_custom_call.1
= control target key start
LH: loop header
LB: loop body
LE: loop exit
PB: predicated region body
PF: predicated region fallthrough
CT: control target
= control target key end

     0   :  { %8 = vsyncpa [#allocation3], 0  ;;  %s191_s0 = inlined_call_operand.vmem [shape: f32[8,32], index: 0, kind: input, shape index: {}]   ;;  %s192_s1 = inlined_call_operand.hbm [shape: f32[8,32], index: 1, kind: input, shape index: {}]   ;;  %s193_s2 = inlined_call_operand.vmem [shape: f32[8,1], index: 2, kind: input, shape index: {}]   ;;  %s194_s3 = inlined_call_operand.hbm [shape: f32[1,1], index: 3, kind: output, shape index: {}]  }
   0x1   :  { %9 = vsyncpa [#allocation4], 0  ;;  %s153_s12 = smov [#allocation2]  }
   0x2   :  { %s18_s13 = sshll.u32 %s153_s12, 4  ;;  %s19_s13 = int_to_ptr.vmem [resolvable:$true] %s18_s13 }
   0x3   :  { %s117_s14 = scalar_lea.vmem %s19_s13, 128  ;;  %p122_p1 = scmp.lt.s32.totalorder %s19_s13, %s19_s13 }
   0x4   :  { %p118_p0 = scmp.ne.s32.totalorder %s19_s13, %s117_s14  ;;  %p123_p2 = scmp.lt.s32.totalorder %s117_s14, %s117_s14 }
   0x6   :  { %p124_p3 = por %p123_p2, %p122_p1 }
   0x8   :  { %p125_p4 = pnand %p124_p3, %p118_p0 }
   0xa   :  { %128 = shalt.err (!%p125_p4)
}
   0xb   :  { %21 = dma.hbm_to_vmem [thread:$0]  %s192_s1, 128, %s19_s13, [#allocation3]  }
   0xc   :  { %149 = dma.done.wait [#allocation3], 128  }
   0xd   :  { %150 = vsyncadd [#allocation3], 4294967168  ;;  %v33_v0 = vld [vmem:[%s191_s0] sm:$0xff]  ;;  %vm39_vm0 = vcmask 261120   ;;  %vm65_vm3 = vcmask 7168   ;;  %vm31_vm4 = vcmask 0  }
   0xe   :  { %v34_v1 = vld [vmem:[#allocation2] sm:$0xff]  ;;  %v154_v21 = vmov 0.0  }
   0xf   :  { %v36_v2 = vsub.f32 %v33_v0, %v34_v1  ;;  %v35_v11 = vld [vmem:[%s193_s2] sm:$0xff]  ;;  %32 = vst.msk [vmem:[#allocation5] sm:$0x1] %vm31_vm4, %v154_v21  ;;  %s155_s2 = smov [#allocation5]  }
  0x10   :  { %v53_v14 = vsub.f32 1.0, %v35_v11  ;;  %s93_s20 = sshll.u32 %s155_s2, 4  ;;  %s94_s20 = int_to_ptr.vmem [resolvable:$true] %s93_s20 }
  0x11   :  { %v37_v3 = vadd.f32 1e-06, %v36_v2  ;;  %s129_s21 = scalar_lea.vmem %s94_s20, 16  ;;  %s133_s22 = scalar_lea.vmem %s94_s20, 32 }
  0x12   :  { %p130_p5 = scmp.ne.s32.totalorder %s94_s20, %s129_s21  ;;  %p134_p6 = scmp.lt.s32.totalorder %s94_s20, %s94_s20 }
  0x13   :  { %v38_v4 = vmul.f32 %v37_v3, %v37_v3  ;;  %p135_p7 = scmp.lt.s32.totalorder %s133_s22, %s129_s21 }
  0x15   :  { %v40_v5 = vsel %vm39_vm0, %v38_v4, 0.0  ;;  %p136_p8 = por %p135_p7, %p134_p6 }
  0x16   :  { %41 = vadd.xlane.f32.xlu0 %v40_v5  ;;  %v64_v29 = vld [vmem:[#allocation5] sm:$0x1] }
  0x17   :  { %p137_p9 = pnand %p136_p8, %p130_p5 }
  0x9f   :  { %v42_v6 = vpop.xlane.xlu0 %41 }
  0xa0   :  { %107 = vrsqrt.f32 %v42_v6  ;;  %vm45_vm1 = vcmp.eq.f32.partialorder %v42_v6, inf  ;;  %v48_v9 = vand.u32 2147483648, %v42_v6  ;;  %vm47_vm2 = vcmp.eq.f32.partialorder %v42_v6, 0.0 }
  0xa1   :  { %v52_v17 = vmul.f32 %v42_v6, %v35_v11 }
  0xad   :  { %v108_v7 = vpop.eup %107 }
  0xae   :  { %v44_v8 = vmul.f32 %v108_v7, %v42_v6 }
  0xb0   :  { %v46_v10 = vsel %vm45_vm1, %v42_v6, %v44_v8 }
  0xb1   :  { %v49_v12 = vsel %vm47_vm2, %v48_v9, %v46_v10 }
  0xb2   :  { %v50_v13 = vsub.f32 1.0, %v49_v12 }
  0xb4   :  { %v51_v15 = vmax.f32 %v50_v13, 0.0 }
  0xb6   :  { %v54_v16 = vmul.f32 %v53_v14, %v51_v15 }
  0xb8   :  { %v55_v18 = vmul.f32 %v54_v16, %v51_v15 }
  0xba   :  { %v56_v19 = vadd.f32 %v55_v18, %v52_v17 }
  0xbc   :  { %v66_v20 = vsel %vm65_vm3, %v56_v19, 0.0 }
  0xbd   :  { %67 = vadd.xlane.f32.xlu0 %v66_v20 }
 0x146   :  { %v68_v22 = vpop.xlane.xlu0 %67 }
 0x147   :  { %v69_v23 = vrot.slane %v68_v22, 4 }
 0x149   :  { %v70_v24 = vadd.f32 %v69_v23, %v68_v22 }
 0x14b   :  { %v71_v25 = vrot.slane %v70_v24, 2 }
 0x14d   :  { %v72_v26 = vadd.f32 %v71_v25, %v70_v24 }
 0x14f   :  { %v73_v27 = vrot.slane %v72_v26, 1 }
 0x151   :  { %v74_v28 = vadd.f32 %v73_v27, %v72_v26 }
 0x153   :  { %102 = vpush %v74_v28 }
 0x184   :  { %s103_s0 = spop %102 }
 0x185   :  { %v76_v30 = vstv %s103_s0 }
 0x186   :  { %v77_v31 = vadd.f32 %v76_v30, %v64_v29 }
 0x188   :  { %79 = vst.msk [vmem:[#allocation5] sm:$0x1] %vm31_vm4, %v77_v31 }
 0x18f   :  { %v83_v32 = vld [vmem:[#allocation5] sm:$0x1] }
 0x190   :  { %v85_v33 = vmul.f32 0.125, %v83_v32 }
 0x192   :  { %86 = vst.msk [vmem:[#allocation5] sm:$0x1] %vm31_vm4, %v85_v33 }
 0x193   :  { %140 = shalt.err (!%p137_p9)
}
 0x194   :  { %96 = dma.vmem_to_hbm [thread:$0]  %s94_s20, 16, %s194_s3, [#allocation4]  }
 0x195   :  { %151 = dma.done.wait [#allocation4], 16  }
 0x196   :  { %152 = vsyncadd [#allocation4], 4294967280 }
 0x197   :  { %100 = vsyncpa [#allocation3], 1 }
 0x198   :  { %101 = vsyncpa [#allocation4], 1 }

</bundles_post_ra>
